<compile_context>
chip_gen: v7x
topology: tpu7x:2x2x1
jax: 0.10.0
libtpu: 0.0.40
codegen_flags: <defaults>
</compile_context>

<pallas_src>
import functools

import jax
import jax.numpy as jnp
from jax.experimental import pallas as pl
from jax.experimental.pallas import tpu as pltpu


LANE = 128        # lane width: hidden / class dims padded to this
MAX_TILE_M = 512  # upper bound on batch tile


def _cdiv(a, b):
    return -(-a // b)


def _round_up(x, m):
    return _cdiv(x, m) * m


def _choose_tiling(batch):
    """Pick (tile_m, padded_batch): >=2 tiles for moderate batches (megacore),
    tile rounded to 16 (bf16 sublanes), last tile mostly full."""
    if batch <= 32:
        return batch, batch                      # single full-dim tile, no padding
    n_tiles = max(_cdiv(batch, MAX_TILE_M), 2)   # >=2 grid steps -> both v7x TCs busy
    tile_m = _round_up(_cdiv(batch, n_tiles), 16)
    return tile_m, _round_up(batch, tile_m)


# ---------------------------------------------------------------------------
# Kernels
# ---------------------------------------------------------------------------

def _mlp_logits(x_ref, w1_ref, b1_ref, w2_ref, b2_ref):
    # bf16 MXU operands, f32 accumulation; bias-add / ReLU in f32 on the VPU.
    x = x_ref[...].astype(jnp.bfloat16)                       # in-kernel cast (VPU)
    h = jnp.dot(x, w1_ref[0], preferred_element_type=jnp.float32)
    h = jnp.maximum(h + b1_ref[0], 0.0)
    o = jnp.dot(h.astype(jnp.bfloat16), w2_ref[0],
                preferred_element_type=jnp.float32)
    return o + b2_ref[0]                                       # (tile_m, classes_p) f32


def _mlp_forward_kernel(mode_ref, x_ref, w1_ref, b1_ref, w2_ref, b2_ref, out_ref):
    del mode_ref  # consumed by the weight index_maps only
    o = _mlp_logits(x_ref, w1_ref, b1_ref, w2_ref, b2_ref)
    out_ref[...] = o.astype(out_ref.dtype)                     # lane-dense bf16 store


def _mlp_predict_kernel(mode_ref, x_ref, w1_ref, b1_ref, w2_ref, b2_ref, out_ref,
                        *, num_classes):
    del mode_ref
    o = _mlp_logits(x_ref, w1_ref, b1_ref, w2_ref, b2_ref)     # (tile_m, classes_p) f32
    cls = jax.lax.broadcasted_iota(jnp.int32, o.shape, 1)
    # Mask padded class lanes so a pad class can never win.
    o = jnp.where(cls < num_classes, o, jnp.float32(-1e30))
    m = jnp.max(o, axis=-1, keepdims=True)
    cand = jnp.where(o == m, cls, jnp.int32(o.shape[-1]))      # first-max tie-break
    out_ref[...] = jnp.min(cand, axis=-1, keepdims=True)       # (tile_m, 1) int32


# ---------------------------------------------------------------------------
# pallas_call plumbing
# ---------------------------------------------------------------------------

def _launch(kernel_fn, out_dtype, out_last, mode_arr, x_p, w1s, b1s, w2s, b2s,
            *, tile_m):
    batch_p, in_dim = x_p.shape
    n_models, _, hid_p = w1s.shape
    classes_p = w2s.shape[-1]
    grid = (batch_p // tile_m,)

    x_bytes = x_p.dtype.itemsize
    o_bytes = jnp.dtype(out_dtype).itemsize
    weight_bytes = ((w1s.size + w2s.size) // n_models) * w1s.dtype.itemsize \
                 + ((b1s.size + b2s.size) // n_models) * b1s.dtype.itemsize

    flops = 2 * batch_p * (in_dim * hid_p + hid_p * classes_p)
    bytes_accessed = batch_p * in_dim * x_bytes + weight_bytes + batch_p * out_last * o_bytes

    # Explicit VMEM budget: x tile double-buffered, weights single-buffered
    # (resident), out tile double-buffered, plus f32 intermediates; 2x margin.
    vmem_bytes = (2 * tile_m * in_dim * x_bytes
                  + weight_bytes
                  + 2 * tile_m * out_last * o_bytes
                  + 4 * tile_m * (hid_p + classes_p))
    vmem_limit = int(min(max(2 * vmem_bytes, 4 << 20), 64 << 20))  # v7x-safe cap

    resident = pl.Buffered(1)  # weight index_map constant in grid idx -> single-buffer

    return pl.pallas_call(
        kernel_fn,
        out_shape=jax.ShapeDtypeStruct((batch_p, out_last), out_dtype),
        grid_spec=pltpu.PrefetchScalarGridSpec(
            num_scalar_prefetch=1,            # `mode` -> SMEM, feeds index_maps
            grid=grid,
            in_specs=[
                # x: streamed over batch tiles, natural (unpadded) K dim.
                pl.BlockSpec((tile_m, in_dim), lambda i, m: (i, 0)),
                # per-model weights/biases, selected by `mode`, resident.
                pl.BlockSpec((1, in_dim, hid_p), lambda i, m: (m[0], 0, 0),
                             pipeline_mode=resident),
                pl.BlockSpec((1, 1, hid_p), lambda i, m: (m[0], 0, 0),
                             pipeline_mode=resident),
                pl.BlockSpec((1, hid_p, classes_p), lambda i, m: (m[0], 0, 0),
                             pipeline_mode=resident),
                pl.BlockSpec((1, 1, classes_p), lambda i, m: (m[0], 0, 0),
                             pipeline_mode=resident),
            ],
            out_specs=pl.BlockSpec((tile_m, out_last), lambda i, m: (i, 0)),
        ),
        compiler_params=pltpu.CompilerParams(
            dimension_semantics=("parallel",),
            vmem_limit_bytes=vmem_limit,
        ),
        cost_estimate=pl.CostEstimate(
            flops=flops, transcendentals=0, bytes_accessed=bytes_accessed),
    )(mode_arr, x_p, w1s, b1s, w2s, b2s)


@functools.partial(jax.jit, static_argnames=("tile_m",))
def _forward_call(mode_arr, x_p, w1s, b1s, w2s, b2s, *, tile_m):
    return _launch(_mlp_forward_kernel, jnp.bfloat16, w2s.shape[-1],
                   mode_arr, x_p, w1s, b1s, w2s, b2s, tile_m=tile_m)


@functools.partial(jax.jit, static_argnames=("tile_m", "num_classes"))
def _predict_call(mode_arr, x_p, w1s, b1s, w2s, b2s, *, tile_m, num_classes):
    kernel = functools.partial(_mlp_predict_kernel, num_classes=num_classes)
    return _launch(kernel, jnp.int32, 1,
                   mode_arr, x_p, w1s, b1s, w2s, b2s, tile_m=tile_m)


# ---------------------------------------------------------------------------
# Module wrapper
# ---------------------------------------------------------------------------

class MultiClassifier:
    """JAX/Pallas analogue of the PyTorch MultiClassifier container.

    `models` is a list of (w1 (in,hid), b1 (hid,), w2 (hid,classes), b2 (classes,))
    tuples.  forward(inputs)/predict(inputs) dispatch to self.mode, like the
    PyTorch container.  NOTE: the forward path deliberately uses bf16 MXU
    operands and bf16 logits output (f32 accumulation) — a precision trade.
    """

    def __init__(self, models, weights):
        self.weights = weights      # stored, unused in forward (matches container)
        self.mode = 0
        self.n_models = len(models)

        w1_0, _, w2_0, _ = models[0]
        self.in_dim = w1_0.shape[0]
        hidden = w1_0.shape[1]
        self.num_classes = w2_0.shape[1]
        hid_p = _round_up(hidden, LANE)           # lane dims padded to 128;
        classes_p = _round_up(self.num_classes, LANE)  # K (in_dim) kept natural.

        def pad2(a, r, c):
            return jnp.pad(a, ((0, r - a.shape[0]), (0, c - a.shape[1])))

        w1s, b1s, w2s, b2s = [], [], [], []
        for (w1, b1, w2, b2) in models:
            w1s.append(pad2(jnp.asarray(w1), self.in_dim, hid_p).astype(jnp.bfloat16))
            b1s.append(pad2(jnp.asarray(b1).reshape(1, -1), 1, hid_p).astype(jnp.float32))
            w2s.append(pad2(jnp.asarray(w2), hid_p, classes_p).astype(jnp.bfloat16))
            b2s.append(pad2(jnp.asarray(b2).reshape(1, -1), 1, classes_p).astype(jnp.float32))

        # Stacked, padded, MXU-ready parameters (one-time cost).
        self.w1s = jnp.stack(w1s)   # (n_models, in_dim, hid_p)      bf16
        self.b1s = jnp.stack(b1s)   # (n_models, 1, hid_p)           f32
        self.w2s = jnp.stack(w2s)   # (n_models, hid_p, classes_p)   bf16
        self.b2s = jnp.stack(b2s)   # (n_models, 1, classes_p)       f32

    def _mode_arr(self):
        mode = int(self.mode)
        if not 0 <= mode < self.n_models:   # guard: index_map would read OOB weights
            raise ValueError(f"mode={mode} out of range [0, {self.n_models})")
        return jnp.asarray([mode], dtype=jnp.int32)

    def _prep_x(self, inputs):
        batch, in_dim = inputs.shape
        assert in_dim == self.in_dim
        tile_m, batch_p = _choose_tiling(batch)
        x = inputs if batch_p == batch else jnp.pad(inputs, ((0, batch_p - batch), (0, 0)))
        return x, tile_m, batch

    def forward(self, inputs):
        x, tile_m, batch = self._prep_x(inputs)
        out = _forward_call(self._mode_arr(), x, self.w1s, self.b1s,
                            self.w2s, self.b2s, tile_m=tile_m)
        return out[:batch, :self.num_classes]          # bf16 logits

    def predict(self, inputs):
        x, tile_m, batch = self._prep_x(inputs)
        idx = _predict_call(self._mode_arr(), x, self.w1s, self.b1s,
                            self.w2s, self.b2s, tile_m=tile_m,
                            num_classes=self.num_classes)
        return idx[:batch, 0]                           # int32 class ids

    # TODO(synk): fit() needs autograd + optimizer.step() + per-model criterion;
    # the training loop is out of scope for a forward-pass Pallas kernel.


def _init_model_params(key, in_dim, hidden, num_classes, dtype=jnp.float32):
    k1, k2, k3, k4 = jax.random.split(key, 4)
    w1 = jax.random.normal(k1, (in_dim, hidden), dtype) * (1.0 / jnp.sqrt(in_dim))
    b1 = jax.random.normal(k2, (hidden,), dtype) * 0.01
    w2 = jax.random.normal(k3, (hidden, num_classes), dtype) * (1.0 / jnp.sqrt(hidden))
    b2 = jax.random.normal(k4, (num_classes,), dtype) * 0.01
    return (w1, b1, w2, b2)


def _ref_logits(x, params):
    w1, b1, w2, b2 = params
    return jnp.maximum(x @ w1 + b1, 0.0) @ w2 + b2


if __name__ == "__main__":
    batch, in_dim, hidden, num_classes = 8, 32, 32, 8
    n_models = 3

    root = jax.random.PRNGKey(0)
    k_x, k_x2, *k_models = jax.random.split(root, 2 + n_models)

    models = [_init_model_params(k_models[i], in_dim, hidden, num_classes)
              for i in range(n_models)]
    ensemble_weights = [0.5, 0.3, 0.2]

    clf = MultiClassifier(models, ensemble_weights)
    x = jax.random.normal(k_x, (batch, in_dim), jnp.float32)

    # One compiled kernel serves every mode; check each against plain-JAX f32.
    # Loose tol: bf16 MXU operands + bf16 logits output, f32 accumulation.
    for mode in range(n_models):
        clf.mode = mode
        logits = clf.forward(x)
        jax.block_until_ready(logits)
        assert logits.shape == (batch, num_classes)

        ref = _ref_logits(x, models[mode])
        err = jnp.max(jnp.abs(logits.astype(jnp.float32) - ref))
        assert jnp.allclose(logits.astype(jnp.float32), ref, atol=1e-1, rtol=0.0), (
            f"mode {mode}: max err {err}")

        preds = clf.predict(x)
        jax.block_until_ready(preds)
        assert preds.shape == (batch,)
        # Fused-argmax check; allow disagreement only on bf16-scale near-ties.
        ref_pred = jnp.argmax(ref, axis=-1)
        top2 = jnp.sort(ref, axis=-1)[:, -2:]
        near_tie = (top2[:, 1] - top2[:, 0]) < 5e-2
        assert bool(jnp.all((preds == ref_pred) | near_tie)), f"mode {mode}: argmax mismatch"

    # Exercise the multi-tile / batch-padded path (grid >= 2, batch not a tile multiple).
    clf.mode = 0
    x2 = jax.random.normal(k_x2, (48, in_dim), jnp.float32)
    logits2 = clf.forward(x2)
    jax.block_until_ready(logits2)
    ref2 = _ref_logits(x2, models[0])
    assert logits2.shape == (48, num_classes)
    assert jnp.allclose(logits2.astype(jnp.float32), ref2, atol=1e-1, rtol=0.0)

    print("KERNEL_OK")
</pallas_src>

<mosaic_0001>
module attributes {stable_mosaic.version = 11 : i64} {
  func.func @_mlp_forward_kernel(%arg0: i32, %arg1: memref<1xi32, #tpu.memory_space<smem>>, %arg2: memref<8x32xf32, #tpu.memory_space<vmem>>, %arg3: memref<1x32x128xbf16, #tpu.memory_space<vmem>>, %arg4: memref<1x1x128xf32, #tpu.memory_space<vmem>>, %arg5: memref<1x128x128xbf16, #tpu.memory_space<vmem>>, %arg6: memref<1x1x128xf32, #tpu.memory_space<vmem>>, %arg7: memref<8x128xbf16, #tpu.memory_space<vmem>>) attributes {dimension_semantics = [#tpu.dimension_semantics<parallel>], iteration_bounds = array<i64: 1>, scalar_prefetch = 1 : i64, scratch_operands = 0 : i64, tpu.core_type = #tpu.core_type<tc>, window_params = [{transform_indices = @transform_0, window_bounds = array<i64: 8, 32>}, {pipeline_mode = #tpu.pipeline_mode<synchronous>, transform_indices = @transform_1, window_bounds = array<i64: 1, 32, 128>}, {pipeline_mode = #tpu.pipeline_mode<synchronous>, transform_indices = @transform_2, window_bounds = array<i64: 1, 1, 128>}, {pipeline_mode = #tpu.pipeline_mode<synchronous>, transform_indices = @transform_3, window_bounds = array<i64: 1, 128, 128>}, {pipeline_mode = #tpu.pipeline_mode<synchronous>, transform_indices = @transform_4, window_bounds = array<i64: 1, 1, 128>}, {transform_indices = @transform_5, window_bounds = array<i64: 8, 128>}]} {
    %c0 = arith.constant 0 : index
    %c0_0 = arith.constant 0 : index
    %0 = vector.load %arg2[%c0, %c0_0] : memref<8x32xf32, #tpu.memory_space<vmem>>, vector<8x32xf32>
    %1 = arith.truncf %0 : vector<8x32xf32> to vector<8x32xbf16>
    %c0_1 = arith.constant 0 : index
    %c0_2 = arith.constant 0 : index
    %c0_3 = arith.constant 0 : index
    %2 = vector.load %arg3[%c0_1, %c0_2, %c0_3] : memref<1x32x128xbf16, #tpu.memory_space<vmem>>, vector<1x32x128xbf16>
    %3 = vector.shape_cast %2 : vector<1x32x128xbf16> to vector<32x128xbf16>
    %cst = arith.constant dense<0.000000e+00> : vector<8x128xf32>
    %4 = tpu.matmul %1, %3, %cst {dimension_numbers = #tpu.dot_dimension_numbers<[1], [0], [0], [1], [0, 0, 1, 1], [], []>} : vector<8x32xbf16>, vector<32x128xbf16>, vector<8x128xf32> -> vector<8x128xf32>
    %c0_4 = arith.constant 0 : index
    %c0_5 = arith.constant 0 : index
    %c0_6 = arith.constant 0 : index
    %5 = vector.load %arg4[%c0_4, %c0_5, %c0_6] : memref<1x1x128xf32, #tpu.memory_space<vmem>>, vector<1x1x128xf32>
    %6 = vector.shape_cast %5 : vector<1x1x128xf32> to vector<1x128xf32>
    %7 = vector.broadcast %6 : vector<1x128xf32> to vector<8x128xf32>
    %8 = arith.addf %4, %7 : vector<8x128xf32>
    %cst_7 = arith.constant 0.000000e+00 : f32
    %9 = vector.broadcast %cst_7 : f32 to vector<8x128xf32>
    %10 = arith.maximumf %8, %9 : vector<8x128xf32>
    %11 = arith.truncf %10 : vector<8x128xf32> to vector<8x128xbf16>
    %c0_8 = arith.constant 0 : index
    %c0_9 = arith.constant 0 : index
    %c0_10 = arith.constant 0 : index
    %12 = vector.load %arg5[%c0_8, %c0_9, %c0_10] : memref<1x128x128xbf16, #tpu.memory_space<vmem>>, vector<1x128x128xbf16>
    %13 = vector.shape_cast %12 : vector<1x128x128xbf16> to vector<128x128xbf16>
    %cst_11 = arith.constant dense<0.000000e+00> : vector<8x128xf32>
    %14 = tpu.matmul %11, %13, %cst_11 {dimension_numbers = #tpu.dot_dimension_numbers<[1], [0], [0], [1], [0, 0, 1, 1], [], []>} : vector<8x128xbf16>, vector<128x128xbf16>, vector<8x128xf32> -> vector<8x128xf32>
    %c0_12 = arith.constant 0 : index
    %c0_13 = arith.constant 0 : index
    %c0_14 = arith.constant 0 : index
    %15 = vector.load %arg6[%c0_12, %c0_13, %c0_14] : memref<1x1x128xf32, #tpu.memory_space<vmem>>, vector<1x1x128xf32>
    %16 = vector.shape_cast %15 : vector<1x1x128xf32> to vector<1x128xf32>
    %17 = vector.broadcast %16 : vector<1x128xf32> to vector<8x128xf32>
    %18 = arith.addf %14, %17 : vector<8x128xf32>
    %19 = arith.truncf %18 : vector<8x128xf32> to vector<8x128xbf16>
    %c0_15 = arith.constant 0 : index
    %c0_16 = arith.constant 0 : index
    %20 = vector.load %arg7[%c0_15, %c0_16] : memref<8x128xbf16, #tpu.memory_space<vmem>>, vector<8x128xbf16>
    tpu.vector_store %arg7[%c0_15, %c0_16], %19 {strides = array<i32>} : memref<8x128xbf16, #tpu.memory_space<vmem>>, vector<8x128xbf16>,
    return
  }
  func.func @transform_0(%arg0: i32, %arg1: memref<1xi32, #tpu.memory_space<smem>>) -> (i32, i32) {
    %c0_i32 = arith.constant 0 : i32
    %c0_i32_0 = arith.constant 0 : i32
    return %arg0, %c0_i32 : i32, i32
  }
  func.func @transform_1(%arg0: i32, %arg1: memref<1xi32, #tpu.memory_space<smem>>) -> (i32, i32, i32) {
    %c0 = arith.constant 0 : index
    %0 = memref.load %arg1[%c0] : memref<1xi32, #tpu.memory_space<smem>>
    %c0_i32 = arith.constant 0 : i32
    %c0_i32_0 = arith.constant 0 : i32
    %c0_i32_1 = arith.constant 0 : i32
    return %0, %c0_i32, %c0_i32_0 : i32, i32, i32
  }
  func.func @transform_2(%arg0: i32, %arg1: memref<1xi32, #tpu.memory_space<smem>>) -> (i32, i32, i32) {
    %c0 = arith.constant 0 : index
    %0 = memref.load %arg1[%c0] : memref<1xi32, #tpu.memory_space<smem>>
    %c0_i32 = arith.constant 0 : i32
    %c0_i32_0 = arith.constant 0 : i32
    %c0_i32_1 = arith.constant 0 : i32
    return %0, %c0_i32, %c0_i32_0 : i32, i32, i32
  }
  func.func @transform_3(%arg0: i32, %arg1: memref<1xi32, #tpu.memory_space<smem>>) -> (i32, i32, i32) {
    %c0 = arith.constant 0 : index
    %0 = memref.load %arg1[%c0] : memref<1xi32, #tpu.memory_space<smem>>
    %c0_i32 = arith.constant 0 : i32
    %c0_i32_0 = arith.constant 0 : i32
    %c0_i32_1 = arith.constant 0 : i32
    return %0, %c0_i32, %c0_i32_0 : i32, i32, i32
  }
  func.func @transform_4(%arg0: i32, %arg1: memref<1xi32, #tpu.memory_space<smem>>) -> (i32, i32, i32) {
    %c0 = arith.constant 0 : index
    %0 = memref.load %arg1[%c0] : memref<1xi32, #tpu.memory_space<smem>>
    %c0_i32 = arith.constant 0 : i32
    %c0_i32_0 = arith.constant 0 : i32
    %c0_i32_1 = arith.constant 0 : i32
    return %0, %c0_i32, %c0_i32_0 : i32, i32, i32
  }
  func.func @transform_5(%arg0: i32, %arg1: memref<1xi32, #tpu.memory_space<smem>>) -> (i32, i32) {
    %c0_i32 = arith.constant 0 : i32
    %c0_i32_0 = arith.constant 0 : i32
    return %arg0, %c0_i32 : i32, i32
  }
}

</mosaic_0001>

<bundles_post_ra>
// kernel: _forward_call.1
= control target key start
LH: loop header
LB: loop body
LE: loop exit
PB: predicated region body
PF: predicated region fallthrough
CT: control target
= control target key end

     0   :  { %12 = vsyncpa [#allocation5], 0  ;;  %s595_s0 = inlined_call_operand.<no memory space> [shape: s32[1], index: 0, kind: input, shape index: {}]   ;;  %s596_s1 = inlined_call_operand.hbm [shape: f32[8,32], index: 1, kind: input, shape index: {}]   ;;  %s597_s2 = inlined_call_operand.hbm [shape: bf16[3,32,128], index: 2, kind: input, shape index: {}]   ;;  %s598_s3 = inlined_call_operand.vmem [shape: f32[3,1,128], index: 3, kind: input, shape index: {}]   ;;  %s599_s4 = inlined_call_operand.hbm [shape: bf16[3,128,128], index: 4, kind: input, shape index: {}]   ;;  %s600_s5 = inlined_call_operand.vmem [shape: f32[3,1,128], index: 5, kind: input, shape index: {}]   ;;  %s601_s6 = inlined_call_operand.hbm [shape: bf16[8,128], index: 6, kind: output, shape index: {}]  }
   0x1   :  { %13 = vsyncpa [#allocation8], 0  ;;  %s328_s23 = sshll.u32 %s595_s0, 8 }
   0x2   :  { %14 = vsyncpa [#allocation6], 0  ;;  %s33_s26 = scalar_lea.hbm %s597_s2, %s328_s23  ;;  %s486_s27 = smov [#allocation7]  }
   0x3   :  { %s34_s28 = sshll.u32 %s486_s27, 4  ;;  %s388_s29 = scalar_lea.hbm %s33_s26, 256  ;;  %s35_s28 = int_to_ptr.vmem [resolvable:$true] %s34_s28 }
   0x4   :  { %p389_p0 = scmp.ne.s32.totalorder %s33_s26, %s388_s29  ;;  %s390_s8 = scalar_lea.hbm %s597_s2, 768 }
   0x5   :  { %p391_p1 = scmp.lt.u32.totalorder %s33_s26, %s597_s2  ;;  %p392_p2 = scmp.lt.u32.totalorder %s390_s8, %s388_s29 }
   0x6   :  { %p394_p4 = scmp.lt.u32.totalorder %s388_s29, %s33_s26 }
   0x7   :  { %p393_p3 = por %p392_p2, %p391_p1 }
   0x9   :  { %p395_p5 = por %p394_p4, %p393_p3 }
   0xb   :  { %p396_p6 = pnand %p395_p5, %p389_p0 }
   0xd   :  { %399 = shalt.err (!%p396_p6)
}
   0xe   :  { %s400_s11 = scalar_lea.vmem %s35_s28, 256  ;;  %p405_p8 = scmp.lt.s32.totalorder %s35_s28, %s35_s28 }
   0xf   :  { %p401_p7 = scmp.ne.s32.totalorder %s35_s28, %s400_s11  ;;  %p406_p9 = scmp.lt.s32.totalorder %s400_s11, %s400_s11 }
  0x11   :  { %p407_p10 = por %p406_p9, %p405_p8 }
  0x13   :  { %p408_p11 = pnand %p407_p10, %p401_p7 }
  0x15   :  { %411 = shalt.err (!%p408_p11)
}
  0x16   :  { %s487_s12 = smov 64   ;;  %s488_s13 = smov 4  }
  0x17   :  { %40 = dma.hbm_to_vmem [thread:$0]  %s33_s26, 256, %s35_s28, [#allocation8], %s487_s12, %s487_s12, %s488_s13  }
  0x18   :  { %s489_s2 = smov [#allocation4]   ;;  %s329_s17 = sshll.u32 %s595_s0, 10 }
  0x19   :  { %s21_s14 = sshll.u32 %s489_s2, 4  ;;  %s412_s20 = scalar_lea.hbm %s596_s1, 128  ;;  %s22_s14 = int_to_ptr.vmem [resolvable:$true] %s21_s14 }
  0x1a   :  { %p413_p12 = scmp.ne.s32.totalorder %s596_s1, %s412_s20  ;;  %p416_p13 = scmp.lt.u32.totalorder %s412_s20, %s596_s1 }
  0x1c   :  { %p418_p0 = pnand %p416_p13, %p413_p12 }
  0x1e   :  { %421 = shalt.err (!%p418_p0)
}
  0x1f   :  { %s422_s25 = scalar_lea.vmem %s22_s14, 128  ;;  %p427_p2 = scmp.lt.s32.totalorder %s22_s14, %s22_s14 }
  0x20   :  { %p423_p1 = scmp.ne.s32.totalorder %s22_s14, %s422_s25  ;;  %p428_p3 = scmp.lt.s32.totalorder %s422_s25, %s422_s25 }
  0x22   :  { %p429_p4 = por %p428_p3, %p427_p2 }
  0x24   :  { %p430_p5 = pnand %p429_p4, %p423_p1 }
  0x26   :  { %433 = shalt.err (!%p430_p5)
}
  0x27   :  { %24 = dma.hbm_to_vmem [thread:$0]  %s596_s1, 128, %s22_s14, [#allocation5]  }
  0x28   :  { %s56_s30 = scalar_lea.hbm %s599_s4, %s329_s17  ;;  %s490_s7 = smov [#allocation9]  }
  0x29   :  { %s57_s8 = sshll.u32 %s490_s7, 4  ;;  %s434_s9 = scalar_lea.hbm %s56_s30, 1024  ;;  %s58_s8 = int_to_ptr.vmem [resolvable:$true] %s57_s8 }
  0x2a   :  { %p435_p6 = scmp.ne.s32.totalorder %s56_s30, %s434_s9  ;;  %s436_s2 = scalar_lea.hbm %s599_s4, 3072 }
  0x2b   :  { %p437_p7 = scmp.lt.u32.totalorder %s56_s30, %s599_s4  ;;  %p438_p8 = scmp.lt.u32.totalorder %s436_s2, %s434_s9 }
  0x2c   :  { %p440_p10 = scmp.lt.u32.totalorder %s434_s9, %s56_s30 }
  0x2d   :  { %p439_p9 = por %p438_p8, %p437_p7 }
  0x2f   :  { %p441_p11 = por %p440_p10, %p439_p9 }
  0x31   :  { %p442_p12 = pnand %p441_p11, %p435_p6 }
  0x33   :  { %445 = shalt.err (!%p442_p12)
}
  0x34   :  { %s446_s1 = scalar_lea.vmem %s58_s8, 1024  ;;  %p451_p0 = scmp.lt.s32.totalorder %s58_s8, %s58_s8 }
  0x35   :  { %p447_p13 = scmp.ne.s32.totalorder %s58_s8, %s446_s1  ;;  %p452_p1 = scmp.lt.s32.totalorder %s446_s1, %s446_s1 }
  0x37   :  { %p453_p2 = por %p452_p1, %p451_p0 }
  0x39   :  { %p454_p3 = pnand %p453_p2, %p447_p13 }
  0x3b   :  { %457 = shalt.err (!%p454_p3)
}
  0x3c   :  { %63 = dma.hbm_to_vmem [thread:$0]  %s56_s30, 1024, %s58_s8, [#allocation8], %s487_s12, %s487_s12, %s488_s13  }
  0x3d   :  { %480 = dma.done.wait [#allocation5], 128  }
  0x3e   :  { %481 = vsyncadd [#allocation5], 4294967168 }
  0x3f   :  { %482 = dma.done.wait [#allocation8], 1280  }
  0x40   :  { %483 = vsyncadd [#allocation8], 4294966016  ;;  %v491_v0 = vmov 0.0   ;;  %vm492_vm0 = vmmov 0   ;;  %v378_v1 = vld [vmem:[#allocation7] sm:$0xff]   ;;  %v379_v2 = vld [vmem:[#allocation7 + $0x8] sm:$0xff]  }
  0x41   :  { %342 = vmatprep.subr.bf16.mxu0 %v491_v0  ;;  %346 = vmatprep.mubr.msk.bf16.mxu0 %vm492_vm0, %v491_v0  ;;  %v101_v3 = vld [vmem:[#allocation4] sm:$0xff]  ;;  %v380_v4 = vld [vmem:[#allocation9] sm:$0xff]   ;;  %vm126_vm1 = vcmask 261120   ;;  %v382_v7 = vld [vmem:[#allocation9 + $0x10] sm:$0xff]   ;;  %p90_p4 = scmp.lt.s32.totalorder %s595_s0, 2  ;;  %s493_s23 = smov [#allocation10]  }
  0x42   :  { %350 = vmatprep.subr.bf16.mxu1 %v491_v0  ;;  %366 = vmatprep.mubr.msk.bf16.mxu1 %vm492_vm0, %v491_v0  ;;  %v102_v5 = vpack.c.bf16 %v101_v3, %v101_v3  ;;  %v381_v6 = vld [vmem:[#allocation9 + $0x8] sm:$0xff]   ;;  %v383_v8 = vld [vmem:[#allocation9 + $0x18] sm:$0xff]   ;;  %v384_v9 = vld [vmem:[#allocation9 + $0x20] sm:$0xff]   ;;  %s291_s24 = sshll.u32 %s493_s23, 4  ;;  %s292_s24 = int_to_ptr.vmem [resolvable:$true] %s291_s24 }
  0x43   :  { %343 = vmatpush3.bf16.msra.mxu0 %v378_v1  ;;  %351 = vmatpush3.bf16.msra.mxu1 %v380_v4  ;;  %v385_v10 = vld [vmem:[#allocation9 + $0x28] sm:$0xff]   ;;  %v386_v11 = vld [vmem:[#allocation9 + $0x30] sm:$0xff]   ;;  %v387_v12 = vld [vmem:[#allocation9 + $0x38] sm:$0xff]   ;;  %s603_s0 = smov (!%p90_p4, %s595_s0), 2  ;;  %p463_p6 = scmp.lt.s32.totalorder %s292_s24, %s292_s24 }
  0x44   :  { %344 = vmatprep.subr.bf16.mxu0 %v491_v0  ;;  %352 = vmatprep.subr.bf16.mxu1 %v491_v0  ;;  %s92_s19 = scalar_lea.vmem %s598_s3, %s603_s0  ;;  %s98_s22 = scalar_lea.vmem %s600_s5, %s603_s0 }
  0x45   :  { %v315_v13 = vld [vmem:[%s92_s19] ss:$0 sm:$0xff]  ;;  %s458_s3 = scalar_lea.vmem %s292_s24, 64 }
  0x46   :  { %v319_v21 = vld [vmem:[%s98_s22] ss:$0 sm:$0xff]  ;;  %p459_p5 = scmp.ne.s32.totalorder %s292_s24, %s458_s3  ;;  %p464_p7 = scmp.lt.s32.totalorder %s458_s3, %s458_s3 }
  0x47   :  { %345 = vmatpush3.bf16.msra.mxu0 %v379_v2  ;;  %353 = vmatpush3.bf16.msra.mxu1 %v381_v6 }
  0x48   :  { %354 = vmatprep.subr.bf16.mxu1 %v491_v0  ;;  %p465_p8 = por %p464_p7, %p463_p6 }
  0x4a   :  { %347 = vmatmul.mubr.msk.bf16.vlgmr.msra.gmra.mrb[0].mxu0 %vm126_vm1, %v102_v5  ;;  %p466_p9 = pnand %p465_p8, %p459_p5 }
  0x4b   :  { %355 = vmatpush3.bf16.msra.mxu1 %v382_v7 }
  0x4c   :  { %356 = vmatprep.subr.bf16.mxu1 %v491_v0 }
  0x4f   :  { %357 = vmatpush3.bf16.msra.mxu1 %v383_v8 }
  0x50   :  { %358 = vmatprep.subr.bf16.mxu1 %v491_v0 }
  0x53   :  { %359 = vmatpush3.bf16.msra.mxu1 %v384_v9 }
  0x54   :  { %360 = vmatprep.subr.bf16.mxu1 %v491_v0 }
  0x57   :  { %361 = vmatpush3.bf16.msra.mxu1 %v385_v10 }
  0x58   :  { %362 = vmatprep.subr.bf16.mxu1 %v491_v0 }
  0x5b   :  { %363 = vmatpush3.bf16.msra.mxu1 %v386_v11 }
  0x5c   :  { %364 = vmatprep.subr.bf16.mxu1 %v491_v0 }
  0x5f   :  { %365 = vmatpush3.bf16.msra.mxu1 %v387_v12 }
 0x11d   :  { %v164_v14 = vpop.f32.mrb[0].mxu0 }
 0x11e   :  { %v165_v15 = vadd.f32 %v315_v13, %v164_v14  ;;  %v348_v16 = vpop.f32.mrb[1].mxu0 }
 0x11f   :  { %v167_v17 = vpop.f32.mrb[2].mxu0 }
 0x120   :  { %v170_v18 = vmax.f32 %v165_v15, 0.0  ;;  %v349_v19 = vpop.f32.mrb[3].mxu0 }
 0x122   :  { %v171_v20 = vpack.c.bf16 %v170_v18, %v170_v18 }
 0x124   :  { %367 = vmatmul.mubr.bf16.vlgmr.msra.gmra.mrb[0].mxu1 %v171_v20 }
 0x1f7   :  { %v277_v22 = vpop.f32.mrb[0].mxu1 }
 0x1f8   :  { %v278_v23 = vadd.f32 %v319_v21, %v277_v22  ;;  %v368_v24 = vpop.f32.mrb[1].mxu1 }
 0x1f9   :  { %v280_v25 = vpop.f32.mrb[2].mxu1 }
 0x1fa   :  { %v283_v26 = vpack.c.bf16 %v278_v23, %v278_v23  ;;  %v369_v27 = vpop.f32.mrb[3].mxu1 }
 0x1fc   :  { %284 = vst [vmem:[#allocation10] sm:$0xf] %v283_v26 }
 0x1fd   :  { %469 = shalt.err (!%p466_p9)
}
 0x1fe   :  { %s470_s5 = scalar_lea.hbm %s601_s6, 64 }
 0x1ff   :  { %p471_p10 = scmp.ne.s32.totalorder %s601_s6, %s470_s5  ;;  %p474_p11 = scmp.lt.u32.totalorder %s470_s5, %s601_s6 }
 0x201   :  { %p476_p12 = pnand %p474_p11, %p471_p10 }
 0x203   :  { %479 = shalt.err (!%p476_p12)
}
 0x204   :  { %294 = dma.vmem_to_hbm [thread:$0]  %s292_s24, 64, %s601_s6, [#allocation6]  }
 0x205   :  { %484 = dma.done.wait [#allocation6], 64  }
 0x206   :  { %485 = vsyncadd [#allocation6], 4294967232 }
 0x207   :  { %298 = vsyncpa [#allocation5], 1 }
 0x208   :  { %299 = vsyncpa [#allocation8], 1 }
 0x209   :  { %300 = vsyncpa [#allocation6], 1 }

</bundles_post_ra>
